<compile_context>
chip_gen: v6e
topology: v6e:2x2x1
jax: 0.10.0
libtpu: 0.0.40
codegen_flags: <defaults>
</compile_context>

<pallas_src>
import functools

import jax
import jax.numpy as jnp
from jax import lax
from jax.experimental import pallas as pl
from jax.experimental.pallas import tpu as pltpu


# ---------------------------------------------------------------------------
# helpers
# ---------------------------------------------------------------------------
def _round_up(n, m):
    return ((n + m - 1) // m) * m


def _pad_to(x, target_shape):
    pads = [(0, t - s) for s, t in zip(x.shape, target_shape)]
    if all(p == (0, 0) for p in pads):
        return x
    return jnp.pad(x, pads)


def _prep_gate_weights(w, h, hp):
    """(..., 4*h) in torch gate order [i,f,g,o] -> (..., 4*hp) in kernel order
    [i,f,o,g]; each gate block zero-padded to hp so in-kernel slices stay
    128-lane aligned and the three sigmoids cover one contiguous slab."""
    lead = w.shape[:-1]
    w4 = w.reshape(lead + (4, h))
    w4 = w4[..., (0, 1, 3, 2), :]                       # i, f, o, g
    w4 = jnp.pad(w4, [(0, 0)] * len(lead) + [(0, 0), (0, hp - h)])
    return w4.reshape(lead + (4 * hp,))


def _activation_dtype():
    """bf16 EUP/VPU exists on v6e/v7x; older chips (v5e and before) keep f32."""
    try:
        kind = jax.devices()[0].device_kind.lower()
    except Exception:
        return jnp.float32
    return jnp.bfloat16 if ("v6" in kind or "v7" in kind) else jnp.float32


def _tensorcores_per_chip():
    """Only used as a tiling heuristic (batch sharding for megacore chips)."""
    try:
        kind = jax.devices()[0].device_kind.lower()
    except Exception:
        return 1
    return 2 if ("v7" in kind or "v4" in kind or "v5p" in kind) else 1


# ---------------------------------------------------------------------------
# Kernel A: tiled matmul, bias folded into the accumulator init
#   out = A @ B + bias
# ---------------------------------------------------------------------------
def _matmul_bias_kernel(a_ref, b_ref, bias_ref, o_ref, acc_ref):
    k = pl.program_id(2)

    @pl.when(k == 0)
    def _():
        # fold the bias into the accumulator init (no epilogue add)
        acc_ref[...] = jnp.broadcast_to(bias_ref[...], acc_ref.shape)

    acc_ref[...] += jnp.dot(a_ref[...], b_ref[...],
                            preferred_element_type=jnp.float32)

    @pl.when(k == pl.num_programs(2) - 1)
    def _():
        o_ref[...] = acc_ref[...].astype(o_ref.dtype)


def _matmul_bias(a, b, bias, out_dtype):
    """a: (M, K) bf16, b: (K, N) bf16, bias: (1, N) f32.  K, N are 128-mults."""
    M, K = a.shape
    _, N = b.shape

    # Big tiles: fill the 256-wide MXU on v6e/v7x, cut per-grid-step overhead
    # and re-streaming of the weight strip.  Fall back to 128 when shapes are
    # small (they are always 128-multiples after wrapper padding).
    tk = 512 if K % 512 == 0 else 256 if K % 256 == 0 else 128
    tn = 256 if N % 256 == 0 else 128
    tm = 256 if M >= 256 else _round_up(M, 8)

    Mp = _round_up(M, tm)
    a = _pad_to(a, (Mp, K))

    out = pl.pallas_call(
        _matmul_bias_kernel,
        out_shape=jax.ShapeDtypeStruct((Mp, N), out_dtype),
        grid_spec=pltpu.PrefetchScalarGridSpec(
            num_scalar_prefetch=0,
            grid=(Mp // tm, N // tn, K // tk),
            in_specs=[
                pl.BlockSpec((tm, tk), lambda i, j, k: (i, k)),
                pl.BlockSpec((tk, tn), lambda i, j, k: (k, j)),
                pl.BlockSpec((1, tn), lambda i, j, k: (0, j)),
            ],
            out_specs=pl.BlockSpec((tm, tn), lambda i, j, k: (i, j)),
            scratch_shapes=[pltpu.VMEM((tm, tn), jnp.float32)],
        ),
        compiler_params=pltpu.CompilerParams(
            dimension_semantics=("parallel", "parallel", "arbitrary"),
            vmem_limit_bytes=48 * 1024 * 1024,
        ),
    )(a, b, bias)
    return out[:M]


# ---------------------------------------------------------------------------
# Kernel B: LSTM recurrence, grid=(batch_tiles, T // Tc), Tc timesteps / step
#   x_proj already contains x @ W_ih + (b_ih + b_hh), gate order [i, f, o, g].
# ---------------------------------------------------------------------------
def _lstm_recurrence_kernel(xp_ref, whh_ref, hs_ref, h_scr, c_scr, *,
                            hidden, t_chunk, act_dtype):
    tci = pl.program_id(1)

    @pl.when(tci == 0)
    def _():
        h_scr[...] = jnp.zeros_like(h_scr)
        c_scr[...] = jnp.zeros_like(c_scr)

    H = hidden
    whh = whh_ref[...]          # (Hp, 4Hp) bf16, constant block index (resident)

    def step(t, carry):
        h = h_scr[...]
        c = c_scr[...]
        # bf16 x_proj (bias already folded) + recurrent term, f32 accumulation
        gates = xp_ref[t].astype(jnp.float32) + jnp.dot(
            h.astype(jnp.bfloat16), whh, preferred_element_type=jnp.float32)

        # gate order [i, f, o, g]: one contiguous sigmoid slab + one tanh slab;
        # activations in bf16 on v6e/v7x (act_dtype), f32 elsewhere.
        sig = jax.nn.sigmoid(gates[:, :3 * H].astype(act_dtype))
        g_g = jnp.tanh(gates[:, 3 * H:].astype(act_dtype)).astype(jnp.float32)
        i_g = sig[:, 0 * H:1 * H].astype(jnp.float32)
        f_g = sig[:, 1 * H:2 * H].astype(jnp.float32)
        o_g = sig[:, 2 * H:3 * H].astype(jnp.float32)

        c_new = f_g * c + i_g * g_g                                   # f32 carry
        h_new = o_g * jnp.tanh(c_new.astype(act_dtype)).astype(jnp.float32)

        c_scr[...] = c_new
        h_scr[...] = h_new
        hs_ref[t] = h_new.astype(hs_ref.dtype)
        return carry

    lax.fori_loop(0, t_chunk, step, 0, unroll=True)


def _pick_time_chunk(T, tb, hp):
    """Largest divisor of T in {8,4,2,1}, keeping the x_proj block modest."""
    for tc in (8, 4, 2, 1):
        if T % tc == 0 and (tc == 1 or tc * tb * 4 * hp * 2 * 2 <= 8 * 1024 * 1024):
            return tc
    return 1


def _lstm_recurrence(x_proj, whh_bf16, hidden_p, *, act_dtype):
    """x_proj: (T, Bp, 4Hp) bf16, whh_bf16: (Hp, 4Hp) bf16 -> hs (T, Bp, Hp) bf16."""
    T, Bp, _ = x_proj.shape
    Hp = hidden_p

    # Single-TC chips (v5e/v6e): one batch tile = fewest serial grid steps and
    # maximum MXU fill.  2-TC chips (v7x / v4 / v5p): split batch in two so the
    # parallel axis actually shards across cores.
    if _tensorcores_per_chip() >= 2 and Bp >= 256 and Bp % 16 == 0:
        tb = Bp // 2
    else:
        tb = Bp
    nb = Bp // tb

    tc = _pick_time_chunk(T, tb, Hp)

    kernel = functools.partial(_lstm_recurrence_kernel, hidden=Hp,
                               t_chunk=tc, act_dtype=act_dtype)
    return pl.pallas_call(
        kernel,
        out_shape=jax.ShapeDtypeStruct((T, Bp, Hp), jnp.bfloat16),
        grid_spec=pltpu.PrefetchScalarGridSpec(
            num_scalar_prefetch=0,
            grid=(nb, T // tc),
            in_specs=[
                pl.BlockSpec((tc, tb, 4 * Hp), lambda bi, ti: (ti, bi, 0)),
                # TODO(synk): on v7x with large H, single-buffer this resident
                # weight block (pipeline_mode=pl.Buffered(1)) to save VMEM.
                pl.BlockSpec((Hp, 4 * Hp), lambda bi, ti: (0, 0)),
            ],
            out_specs=pl.BlockSpec((tc, tb, Hp), lambda bi, ti: (ti, bi, 0)),
            scratch_shapes=[pltpu.VMEM((tb, Hp), jnp.float32),   # h carry
                            pltpu.VMEM((tb, Hp), jnp.float32)],  # c carry
        ),
        compiler_params=pltpu.CompilerParams(
            dimension_semantics=("parallel", "arbitrary"),
            vmem_limit_bytes=48 * 1024 * 1024,
        ),
    )(x_proj, whh_bf16)


# ---------------------------------------------------------------------------
# Full forward (matches the PyTorch LSTMDecoder.forward)
# ---------------------------------------------------------------------------
def lstm_decoder_forward(features, captions, params, *, logits_dtype=jnp.float32):
    """features: (B, E) f32; captions: (B, Tcap) int32 -> logits (B, Tcap, V)."""
    emb_table = params["embedding"]            # (V, E)
    wih = params["w_ih"]                       # (E, 4H)   (transposed vs torch)
    whh = params["w_hh"]                       # (H, 4H)
    b = params["b"]                            # (1, 4H)   (= b_ih + b_hh)
    wfc = params["w_fc"]                       # (H, V)
    bfc = params["b_fc"]                       # (1, V)

    B = features.shape[0]
    E = emb_table.shape[1]
    H = whh.shape[0]
    V = wfc.shape[1]

    # TODO(synk): embedding gather + feature concat are XLA glue (no Pallas win).
    emb = jnp.take(emb_table, captions[:, :-1], axis=0)          # (B, Tcap-1, E)
    x = jnp.concatenate([features[:, None, :], emb], axis=1)     # (B, T, E)
    x = x.astype(jnp.float32)
    T = x.shape[1]

    # padded, hardware-friendly sizes
    Bp = _round_up(B, 8)
    Ep = _round_up(E, 128)
    Hp = _round_up(H, 128)
    Vp = _round_up(V, 128)

    # time-major, padded inputs: (T, Bp, Ep)
    x_tm = _pad_to(jnp.transpose(x, (1, 0, 2)), (T, Bp, Ep))

    # pad weights; gate blocks padded + reordered to [i, f, o, g]
    wih_p = _prep_gate_weights(_pad_to(wih, (Ep, 4 * H)), H, Hp)     # (Ep, 4Hp)
    whh_p = _prep_gate_weights(_pad_to(whh, (Hp, 4 * H)), H, Hp)     # (Hp, 4Hp)
    b_p = _prep_gate_weights(b, H, Hp)                               # (1, 4Hp)
    wfc_p = _pad_to(wfc, (Hp, Vp))                                   # (Hp, Vp)
    bfc_p = _pad_to(bfc, (1, Vp))                                    # (1, Vp)

    # 1) input projection for all timesteps (bias folded), emitted in bf16 so
    #    the serial recurrence streams half the bytes per step.
    x_flat = x_tm.reshape(T * Bp, Ep).astype(jnp.bfloat16)
    x_proj = _matmul_bias(x_flat, wih_p.astype(jnp.bfloat16),
                          b_p.astype(jnp.float32), jnp.bfloat16)     # (T*Bp, 4Hp) bf16
    x_proj = x_proj.reshape(T, Bp, 4 * Hp)

    # 2) serial LSTM recurrence (only h @ W_hh + gate math on the critical path)
    hs = _lstm_recurrence(x_proj, whh_p.astype(jnp.bfloat16), Hp,
                          act_dtype=_activation_dtype())             # (T, Bp, Hp) bf16

    # 3) final FC over all hidden states as one tiled matmul
    hs_flat = hs.reshape(T * Bp, Hp)
    logits = _matmul_bias(hs_flat, wfc_p.astype(jnp.bfloat16),
                          bfc_p.astype(jnp.float32), logits_dtype)   # (T*Bp, Vp)
    logits = logits.reshape(T, Bp, Vp)

    # back to batch-first, drop padding
    return jnp.transpose(logits, (1, 0, 2))[:B, :, :V]               # (B, T, V)


# ---------------------------------------------------------------------------
# Pure-JAX f32 reference (identical semantics) for verification
# ---------------------------------------------------------------------------
def _reference_forward(features, captions, params):
    emb = jnp.take(params["embedding"], captions[:, :-1], axis=0)
    x = jnp.concatenate([features[:, None, :], emb], axis=1)         # (B, T, E)
    B, T, _ = x.shape
    H = params["w_hh"].shape[0]

    def step(carry, x_t):
        h, c = carry
        gates = x_t @ params["w_ih"] + h @ params["w_hh"] + params["b"]
        i_g = jax.nn.sigmoid(gates[:, 0 * H:1 * H])
        f_g = jax.nn.sigmoid(gates[:, 1 * H:2 * H])
        g_g = jnp.tanh(gates[:, 2 * H:3 * H])
        o_g = jax.nn.sigmoid(gates[:, 3 * H:4 * H])
        c_new = f_g * c + i_g * g_g
        h_new = o_g * jnp.tanh(c_new)
        return (h_new, c_new), h_new

    h0 = jnp.zeros((B, H), jnp.float32)
    c0 = jnp.zeros((B, H), jnp.float32)
    _, hs = lax.scan(step, (h0, c0), jnp.transpose(x, (1, 0, 2)))
    hs = jnp.transpose(hs, (1, 0, 2))                                # (B, T, H)
    return hs @ params["w_fc"] + params["b_fc"]


def init_params(key, embed_size, hidden_size, vocab_size):
    ks = jax.random.split(key, 7)
    s = 0.1
    return {
        "embedding": s * jax.random.normal(ks[0], (vocab_size, embed_size), jnp.float32),
        # stored transposed relative to torch so the kernel does x @ W
        "w_ih": s * jax.random.normal(ks[1], (embed_size, 4 * hidden_size), jnp.float32),
        "w_hh": s * jax.random.normal(ks[2], (hidden_size, 4 * hidden_size), jnp.float32),
        # combined bias = b_ih + b_hh
        "b": (s * jax.random.normal(ks[3], (1, 4 * hidden_size), jnp.float32)
              + s * jax.random.normal(ks[4], (1, 4 * hidden_size), jnp.float32)),
        "w_fc": s * jax.random.normal(ks[5], (hidden_size, vocab_size), jnp.float32),
        "b_fc": s * jax.random.normal(ks[6], (1, vocab_size), jnp.float32),
    }


if __name__ == "__main__":
    B, EMBED, HIDDEN, VOCAB, T_CAP = 2, 16, 32, 32, 8

    key = jax.random.PRNGKey(0)
    k_par, k_feat, k_cap = jax.random.split(key, 3)

    params = init_params(k_par, EMBED, HIDDEN, VOCAB)
    features = jax.random.normal(k_feat, (B, EMBED), jnp.float32)
    captions = jax.random.randint(k_cap, (B, T_CAP), 0, VOCAB, dtype=jnp.int32)

    out = jax.block_until_ready(lstm_decoder_forward(features, captions, params))
    ref = jax.block_until_ready(_reference_forward(features, captions, params))

    assert out.shape == (B, T_CAP, VOCAB), out.shape
    # bf16 MXU path (bf16 x_proj stream + bf16 activations on v6e/v7x) vs f32
    # reference -> loosened tolerance.
    assert jnp.allclose(out, ref, atol=5e-2, rtol=5e-2), (
        "mismatch vs reference, max abs err = %f" % float(jnp.max(jnp.abs(out - ref))))

    print("KERNEL_OK")
</pallas_src>

<mosaic_0001>
module attributes {stable_mosaic.version = 11 : i64} {
  func.func @_matmul_bias_kernel(%arg0: i32, %arg1: i32, %arg2: i32, %arg3: memref<64x128xbf16, #tpu.memory_space<vmem>>, %arg4: memref<128x256xbf16, #tpu.memory_space<vmem>>, %arg5: memref<1x256xf32, #tpu.memory_space<vmem>>, %arg6: memref<64x256xbf16, #tpu.memory_space<vmem>>, %arg7: memref<64x256xf32, #tpu.memory_space<vmem>>) attributes {dimension_semantics = [#tpu.dimension_semantics<parallel>, #tpu.dimension_semantics<parallel>, #tpu.dimension_semantics<arbitrary>], iteration_bounds = array<i64: 1, 2, 1>, scalar_prefetch = 0 : i64, scratch_operands = 1 : i64, tpu.core_type = #tpu.core_type<tc>, window_params = [{transform_indices = @transform_0, window_bounds = array<i64: 64, 128>}, {transform_indices = @transform_1, window_bounds = array<i64: 128, 256>}, {transform_indices = @transform_2, window_bounds = array<i64: 1, 256>}, {transform_indices = @transform_3, window_bounds = array<i64: 64, 256>}]} {
    %c0_i32 = arith.constant 0 : i32
    %0 = arith.cmpi eq, %arg2, %c0_i32 : i32
    %1 = arith.extui %0 : i1 to i32
    %c0_i32_0 = arith.constant 0 : i32
    %2 = arith.cmpi ne, %1, %c0_i32_0 : i32
    scf.if %2 {
      %c0_10 = arith.constant 0 : index
      %c0_11 = arith.constant 0 : index
      %12 = vector.load %arg5[%c0_10, %c0_11] : memref<1x256xf32, #tpu.memory_space<vmem>>, vector<1x256xf32>
      %13 = vector.shape_cast %12 : vector<1x256xf32> to vector<1x256xf32>
      %14 = vector.broadcast %13 : vector<1x256xf32> to vector<64x256xf32>
      %c0_12 = arith.constant 0 : index
      %c0_13 = arith.constant 0 : index
      %15 = vector.load %arg7[%c0_12, %c0_13] : memref<64x256xf32, #tpu.memory_space<vmem>>, vector<64x256xf32>
      tpu.vector_store %arg7[%c0_12, %c0_13], %14 {strides = array<i32>} : memref<64x256xf32, #tpu.memory_space<vmem>>, vector<64x256xf32>,
    } else {
    }
    %c0 = arith.constant 0 : index
    %c0_1 = arith.constant 0 : index
    %3 = vector.load %arg7[%c0, %c0_1] : memref<64x256xf32, #tpu.memory_space<vmem>>, vector<64x256xf32>
    %c0_2 = arith.constant 0 : index
    %c0_3 = arith.constant 0 : index
    %4 = vector.load %arg3[%c0_2, %c0_3] : memref<64x128xbf16, #tpu.memory_space<vmem>>, vector<64x128xbf16>
    %c0_4 = arith.constant 0 : index
    %c0_5 = arith.constant 0 : index
    %5 = vector.load %arg4[%c0_4, %c0_5] : memref<128x256xbf16, #tpu.memory_space<vmem>>, vector<128x256xbf16>
    %cst = arith.constant dense<0.000000e+00> : vector<64x256xf32>
    %6 = tpu.matmul %4, %5, %cst {dimension_numbers = #tpu.dot_dimension_numbers<[1], [0], [0], [1], [0, 0, 1, 1], [], []>} : vector<64x128xbf16>, vector<128x256xbf16>, vector<64x256xf32> -> vector<64x256xf32>
    %7 = arith.addf %3, %6 : vector<64x256xf32>
    %c0_6 = arith.constant 0 : index
    %c0_7 = arith.constant 0 : index
    %8 = vector.load %arg7[%c0_6, %c0_7] : memref<64x256xf32, #tpu.memory_space<vmem>>, vector<64x256xf32>
    tpu.vector_store %arg7[%c0_6, %c0_7], %7 {strides = array<i32>} : memref<64x256xf32, #tpu.memory_space<vmem>>, vector<64x256xf32>,
    %c0_i32_8 = arith.constant 0 : i32
    %9 = arith.cmpi eq, %arg2, %c0_i32_8 : i32
    %10 = arith.extui %9 : i1 to i32
    %c0_i32_9 = arith.constant 0 : i32
    %11 = arith.cmpi ne, %10, %c0_i32_9 : i32
    scf.if %11 {
      %c0_10 = arith.constant 0 : index
      %c0_11 = arith.constant 0 : index
      %12 = vector.load %arg7[%c0_10, %c0_11] : memref<64x256xf32, #tpu.memory_space<vmem>>, vector<64x256xf32>
      %13 = arith.truncf %12 : vector<64x256xf32> to vector<64x256xbf16>
      %c0_12 = arith.constant 0 : index
      %c0_13 = arith.constant 0 : index
      %14 = vector.load %arg6[%c0_12, %c0_13] : memref<64x256xbf16, #tpu.memory_space<vmem>>, vector<64x256xbf16>
      tpu.vector_store %arg6[%c0_12, %c0_13], %13 {strides = array<i32>} : memref<64x256xbf16, #tpu.memory_space<vmem>>, vector<64x256xbf16>,
    } else {
    }
    return
  }
  func.func @transform_0(%arg0: i32, %arg1: i32, %arg2: i32) -> (i32, i32) {
    %c0_i32 = arith.constant 0 : i32
    return %arg0, %arg2 : i32, i32
  }
  func.func @transform_1(%arg0: i32, %arg1: i32, %arg2: i32) -> (i32, i32) {
    %c0_i32 = arith.constant 0 : i32
    return %arg2, %arg1 : i32, i32
  }
  func.func @transform_2(%arg0: i32, %arg1: i32, %arg2: i32) -> (i32, i32) {
    %c0_i32 = arith.constant 0 : i32
    %c0_i32_0 = arith.constant 0 : i32
    return %c0_i32, %arg1 : i32, i32
  }
  func.func @transform_3(%arg0: i32, %arg1: i32, %arg2: i32) -> (i32, i32) {
    %c0_i32 = arith.constant 0 : i32
    return %arg0, %arg1 : i32, i32
  }
}

</mosaic_0001>

<bundles_post_ra>
// kernel: tpu_custom_call.1
= control target key start
LH: loop header
LB: loop body
LE: loop exit
PB: predicated region body
PF: predicated region fallthrough
CT: control target
= control target key end

     0   :  { %8 = vsyncpa [#allocation4], 0  ;;  %s1404_s0 = inlined_call_operand.hbm [shape: bf16[64,128], index: 0, kind: input, shape index: {}]   ;;  %s1405_s1 = inlined_call_operand.hbm [shape: bf16[128,512], index: 1, kind: input, shape index: {}]   ;;  %s1406_s2 = inlined_call_operand.hbm [shape: f32[1,512], index: 2, kind: input, shape index: {}]   ;;  %s1407_s3 = inlined_call_operand.hbm [shape: bf16[64,512], index: 3, kind: output, shape index: {}]  }
   0x1   :  { %9 = vsyncpa [#allocation7], 0 }
   0x2   :  { %11 = vsyncpa [#allocation7 + $0x1], 0 }
   0x3   :  { %12 = vsyncpa [#allocation5], 0 }
   0x4   :  { %14 = vsyncpa [#allocation5 + $0x1], 0  ;;  %s1174_s12 = smov 0   ;;  %s1176_s13 = smov 0  }
   0x5   :  { %s1178_s14 = smov 0   ;;  %s1180_s15 = smov 0  }
   0x6   :  { %s1182_s16 = smov 0   ;;  %s1184_s17 = smov 0  }
   0x7 LB: > { %s35_s18 = sadd.s32 1, %s1135_s16  ;;  %s76_s19 = sadd.s32 1, %s1127_s14  ;;  %s1139_s17 = sphi %s1184_s17, %s20_s17   ;;  %s1135_s16 = sphi %s1182_s16, %s1427_s16   ;;  %s1131_s15 = sphi %s1180_s15, %s1426_s15   ;;  %s1127_s14 = sphi %s1178_s14, %s1425_s14   ;;  %s1123_s13 = sphi %s1176_s13, %s1424_s13   ;;  %s1119_s12 = sphi %s1174_s12, %s1423_s12  }
   0x8   : > { %p37_p0 = scmp.ge.s32.totalorder %s35_s18, 2  ;;  %p83_p1 = scmp.ne.s32.totalorder %s1127_s14, %s1123_s13 }
   0x9   : > { %p84_p2 = scmp.eq.s32.totalorder %s1139_s17, 0  ;;  %p884_p5 = scmp.lt.s32.totalorder %s1139_s17, 2 }
   0xa   : > { %s1429_s18 = smov (%p37_p0, %s35_s18), 0  ;;  %s184_s21 = sand.u32 1, %s1139_s17  }
   0xb   : > { %p85_p4 = por %p84_p2, %p83_p1  ;;  %s72_s20 = ssub.s32 %s1135_s16, %s1429_s18 }
   0xc   : > { %p74_p6 = scmp.eq.s32.totalorder %s72_s20, 0  ;;  %s186_s22 = sand.u32 1, %s1127_s14  }
   0xd   : > { %s831_s23 = sshll.u32 %s1135_s16, 7  ;;  %s787_s25 = sshll.u32 %s186_s22, 7 }
   0xe   : > { %s1222_s24 = scalar_select %p74_p6, %s1127_s14, %s76_s19  }
   0xf   : > { %s197_s28 = scalar_lea.hbm %s1405_s1, %s831_s23  ;;  %p1229_p7 = pnand %p884_p5, %p85_p4 }
  0x10   : > { %s188_s30 = scalar_lea.vmem [#allocation6], %s787_s25  ;;  %s1233_s5 = scalar_lea.sflag [#allocation7], %s184_s21 }
  0x11   : > { %s198_s4 = sshll.u32 %s188_s30, 4  ;;  %p1409_p8 = pneg %p1229_p7  ;;  %s199_s4 = int_to_ptr.vmem [resolvable:$true] %s198_s4 }
  0x12   : > { %s986_s6 = scalar_lea.vmem %s199_s4, 2048  ;;  %s1141_s7 = smov [#allocation6]  }
  0x13   : > { %p987_p9 = scmp.ne.s32.totalorder %s199_s4, %s986_s6  ;;  %s991_s8 = sshll.u32 %s1141_s7, 4  ;;  %s992_s8 = int_to_ptr.vmem [resolvable:$false] %s991_s8 }
  0x14   : > { %s993_s9 = scalar_lea.vmem %s992_s8, 4096  ;;  %p994_p12 = scmp.lt.s32.totalorder %s199_s4, %s992_s8 }
  0x15   : > { %p989_p10 = pnand %p987_p9, %p1409_p8  ;;  %p995_p13 = scmp.lt.s32.totalorder %s993_s9, %s986_s6 }
  0x17   : > { %p990_p11 = pneg %p989_p10  ;;  %p996_p0 = por %p995_p13, %p994_p12 }
  0x19   : > { %p997_p2 = pnand %p996_p0, %p990_p11 }
  0x1b   : > { %1000 = shalt.err (!%p997_p2)
}
  0x1c   : > { %s1142_s10 = smov 256   ;;  %s1143_s11 = smov 128  }
  0x1d   : > { %s1144_s19 = smov 8   ;;  %s1244_s20 = sadd.s32 4294967295, %s1139_s17  }
  0x1e   : > { %875 = dma.hbm_to_vmem [thread:$0]  (!%p1229_p7), %s197_s28, 2048, %s199_s4, %s1233_s5, %s1142_s10, %s1143_s11, %s1144_s19  }
  0x1f   : > { %s783_s21 = sadd.s32 4294967294, %s1139_s17   ;;  %p89_p4 = scmp.ne.s32.totalorder %s1123_s13, %s1119_s12 }
  0x20   : > { %p1408_p5 = scmp.eq.s32.totalorder %s1244_s20, 0  ;;  %p141_p6 = scmp.eq.s32.totalorder %s1244_s20, 1 }
  0x21   : > { %p147_p9 = scmp.eq.s32.totalorder %s783_s21, 1  ;;  %p784_p11 = scmp.ge.s32.totalorder %s1139_s17, 1 }
  0x22   : > { %p1253_p10 = por %p1408_p5, %p89_p4  ;;  %p1261_p12 = por %p141_p6, %p83_p1 }
  0x23   : > { %p1265_p13 = por %p147_p9, %p89_p4  ;;  %p154_p0 = scmp.lt.s32.totalorder %s1139_s17, 3 }
  0x24   : > { %s1413_s25 = scalar_select %p1261_p12, 1, 0 }
  0x25   : > { %s1414_s26 = scalar_select %p1265_p13, 1, 0 }
  0x26   : > { %p1270_p2 = pnand %p784_p11, %p154_p0  ;;  %s1145_s28 = smov [#allocation3]  }
  0x27   : > { %s170_s30 = sshll.u32 %s1145_s28, 4  ;;  %s790_s4 = sshll.u32 %s186_s22, 1  ;;  %s171_s30 = int_to_ptr.vmem [resolvable:$true] %s170_s30 }
  0x28   : > { %p868_p3 = pneg %p1270_p2  ;;  %s832_s6 = sshll.u32 %s1135_s16, 5 }
  0x29   : > { %s1288_s10 = scalar_lea.hbm %s1406_s2, %s832_s6  ;;  %s212_s11 = scalar_lea.vmem [#allocation8], %s790_s4 }
  0x2a   : > { %p1281_p1 = pnand %p868_p3, %p1408_p5  ;;  %s220_s19 = sshll.u32 %s212_s11, 4  ;;  %s221_s19 = int_to_ptr.vmem [resolvable:$true] %s220_s19 }
  0x2b   : > { %s1012_s21 = scalar_lea.vmem %s171_s30, 512  ;;  %p1020_p0 = scmp.lt.s32.totalorder %s171_s30, %s171_s30 }
  0x2c   : > { %p1003_p4 = pneg %p1281_p1  ;;  %p1013_p6 = scmp.ne.s32.totalorder %s171_s30, %s1012_s21 }
  0x2d   : > { %p1021_p3 = scmp.lt.s32.totalorder %s1012_s21, %s1012_s21 }
  0x2e   : > { %p1015_p9 = pnand %p1013_p6, %p1003_p4 }
  0x2f   : > { %p1022_p5 = por %p1021_p3, %p1020_p0 }
  0x30   : > { %p1016_p11 = pneg %p1015_p9 }
  0x32   : > { %p1023_p8 = pnand %p1022_p5, %p1016_p11 }
  0x34   : > { %1026 = shalt.err (!%p1023_p8)
}
  0x35   : > { %s1146_s22 = smov 64   ;;  %s1147_s28 = smov 4  }
  0x36   : > { %871 = dma.hbm_to_vmem [thread:$0]  (!%p1281_p1), %s1404_s0, 512, %s171_s30, [#allocation4], %s1146_s22, %s1146_s22, %s1147_s28  }
  0x37   : > { %s1040_s8 = scalar_lea.vmem %s221_s19, 32  ;;  %p1417_p12 = pneg %p1229_p7 }
  0x38   : > { %p1041_p13 = scmp.ne.s32.totalorder %s221_s19, %s1040_s8  ;;  %s1148_s9 = smov [#allocation8]  }
  0x39   : > { %s1045_s11 = sshll.u32 %s1148_s9, 4  ;;  %s1046_s11 = int_to_ptr.vmem [resolvable:$false] %s1045_s11 }
  0x3a   : > { %p1043_p4 = pnand %p1041_p13, %p1417_p12  ;;  %s1047_s21 = scalar_lea.vmem %s1046_s11, 64 }
  0x3b   : > { %p1048_p8 = scmp.lt.s32.totalorder %s221_s19, %s1046_s11  ;;  %p1049_p5 = scmp.lt.s32.totalorder %s1047_s21, %s1040_s8 }
  0x3c   : > { %p1044_p6 = pneg %p1043_p4 }
  0x3d   : > { %p1050_p9 = por %p1049_p5, %p1048_p8 }
  0x3f   : > { %p1051_p11 = pnand %p1050_p9, %p1044_p6 }
  0x41   : > { %1054 = shalt.err (!%p1051_p11)
}
  0x42   : > { %878 = dma.hbm_to_vmem [thread:$0]  (!%p1229_p7), %s1288_s10, 32, %s221_s19, %s1233_s5  }
  0x43   : > { %229 = sbr.rel (%p1270_p2) target bundleno = 337 (0x151), region = 32  ;;  %p1418_p12 = scmp.eq.s32.totalorder (!%p1270_p2), %s1244_s20, 0 }
  0x48   : > { %1106 = dma.done.wait (%p1418_p12), [#allocation4], 512   ;;  %p1419_p13 = pmov %p1418_p12 }
  0x49   : > { %s235_s30 = sand.u32 1, %s1244_s20   ;;  %s1312_s7 = sand.u32 1, %s1123_s13  }
  0x4a   : > { %1108 = vsyncadd (%p1419_p13), [#allocation4], 4294966784  ;;  %s795_s29 = sshll.u32 %s1312_s7, 7  ;;  %s236_s22 = scalar_lea.sflag [#allocation7], %s235_s30 }
  0x4b   : > { %s1315_s28 = scalar_lea.vmem [#allocation6], %s795_s29 }
  0x4c   : > { %1110 = dma.done.wait (%p1253_p10), %s236_s22, 2080  }
  0x4d   : > { %1112 = vsyncadd (%p1253_p10), %s236_s22, 4294965216  ;;  %v1149_v0 = vmov 0   ;;  %v945_v1 = vld [vmem:[%s1315_s28 + $0x74] ss:$8 sps:$4 sm:$0xff]   ;;  %v947_v2 = vld [vmem:[%s1315_s28 + $0x70] ss:$8 sps:$4 sm:$0xff]   ;;  %v289_v21 = vlaneseq }
  0x4e   : > { %491 = vmatprep.mubr.bf16.mxu0 %v1149_v0  ;;  %511 = vmatprep.mubr.bf16.mxu1 %v1149_v0  ;;  %v948_v3 = vld [vmem:[%s1315_s28 + $0x64] ss:$8 sps:$4 sm:$0xff]   ;;  %v950_v4 = vld [vmem:[%s1315_s28 + $0x60] ss:$8 sps:$4 sm:$0xff]   ;;  %v951_v5 = vld [vmem:[%s1315_s28 + $0x54] ss:$8 sps:$4 sm:$0xff]  }
  0x4f   : > { %459 = vmatprep.subr.bf16.mxu0 %v945_v1  ;;  %842 = vmatprep.subr.bf16.mxu1 %v945_v1  ;;  %v953_v6 = vld [vmem:[%s1315_s28 + $0x50] ss:$8 sps:$4 sm:$0xff]   ;;  %v954_v7 = vld [vmem:[%s1315_s28 + $0x44] ss:$8 sps:$4 sm:$0xff]   ;;  %v956_v8 = vld [vmem:[%s1315_s28 + $0x40] ss:$8 sps:$4 sm:$0xff]  }
  0x50   : > { %460 = vmatpush1.bf16.msra.mxu0 %v947_v2  ;;  %850 = vmatpush1.bf16.msra.mxu1 %v947_v2  ;;  %v957_v9 = vld [vmem:[%s1315_s28 + $0x34] ss:$8 sps:$4 sm:$0xff]   ;;  %v959_v10 = vld [vmem:[%s1315_s28 + $0x30] ss:$8 sps:$4 sm:$0xff]   ;;  %v960_v11 = vld [vmem:[%s1315_s28 + $0x24] ss:$8 sps:$4 sm:$0xff]  }
  0x51   : > { %461 = vmatprep.subr.bf16.mxu0 %v948_v3  ;;  %843 = vmatprep.subr.bf16.mxu1 %v948_v3  ;;  %v962_v12 = vld [vmem:[%s1315_s28 + $0x20] ss:$8 sps:$4 sm:$0xff]   ;;  %v963_v13 = vld [vmem:[%s1315_s28 + $0x14] ss:$8 sps:$4 sm:$0xff]   ;;  %v965_v14 = vld [vmem:[%s1315_s28 + $0x10] ss:$8 sps:$4 sm:$0xff]  }
  0x52   : > { %v966_v15 = vld [vmem:[%s1315_s28 + $0x4] ss:$8 sps:$4 sm:$0xff]   ;;  %v968_v16 = vld [vmem:[%s1315_s28] ss:$8 sps:$4 sm:$0xff]   ;;  %v970_v18 = vld [vmem:[#allocation3 + $0x10] sm:$0xff]   ;;  %s796_s5 = sshll.u32 %s1312_s7, 1 }
  0x53   : > { %v969_v17 = vld [vmem:[#allocation3] sm:$0xff]   ;;  %v971_v19 = vld [vmem:[#allocation3 + $0x8] sm:$0xff]   ;;  %v972_v20 = vld [vmem:[#allocation3 + $0x18] sm:$0xff]   ;;  %v290_v22 = vshrl.u32 %v289_v21, 7  ;;  %s248_s20 = scalar_lea.vmem [#allocation8], %s796_s5  ;;  %s797_s23 = sshll.u32 %s1312_s7, 6 }
  0x54   : > { %462 = vmatpush1.bf16.msra.mxu0 %v950_v4  ;;  %851 = vmatpush1.bf16.msra.mxu1 %v950_v4  ;;  %v287_v25 = vld [vmem:[%s248_s20] sm:$0x3]  ;;  %s1339_s27 = scalar_lea.vmem [#allocation9], %s797_s23  ;;  %s841_s19 = sshll.u32 %s1131_s15, 7 }
  0x55   : > { %463 = vmatprep.subr.bf16.mxu0 %v951_v5  ;;  %844 = vmatprep.subr.bf16.mxu1 %v951_v5  ;;  %v291_v23 = vsub.s32 0, %v290_v22  ;;  %v295_v24 = vsub.s32 1, %v290_v22  ;;  %s656_s10 = sshll.u32 %s1339_s27, 4  ;;  %s1354_s8 = scalar_lea.hbm %s1407_s3, %s841_s19  ;;  %s1347_s10 = int_to_ptr.vmem [resolvable:$true] %s656_s10 }
  0x56   : > { %s640_s15 = scalar_lea.sflag [#allocation5], %s1312_s7  ;;  %s1055_s9 = scalar_lea.vmem %s1347_s10, 1024 }
  0x57   : > { %v292_v26 = vrot.slane %v287_v25, %v291_v23  ;;  %v296_v27 = vrot.slane %v287_v25, %v295_v24  ;;  %p1056_p7 = scmp.ne.s32.totalorder %s1347_s10, %s1055_s9  ;;  %p1420_p10 = scmp.ne.s32.totalorder %s1413_s25, 0 }
  0x58   : > { %464 = vmatpush1.bf16.msra.mxu0 %v953_v6  ;;  %852 = vmatpush1.bf16.msra.mxu1 %v953_v6  ;;  %s1150_s11 = smov [#allocation9]  }
  0x59   : > { %465 = vmatprep.subr.bf16.mxu0 %v954_v7  ;;  %845 = vmatprep.subr.bf16.mxu1 %v954_v7  ;;  %p1057_p2 = pnand %p1056_p7, %p1420_p10  ;;  %s1059_s21 = sshll.u32 %s1150_s11, 4  ;;  %s1060_s21 = int_to_ptr.vmem [resolvable:$false] %s1059_s21 }
  0x5a   : > { %s1061_s30 = scalar_lea.vmem %s1060_s21, 2048  ;;  %p1062_p0 = scmp.lt.s32.totalorder %s1347_s10, %s1060_s21 }
  0x5b   : > { %p1058_p1 = pneg %p1057_p2  ;;  %p1063_p3 = scmp.lt.s32.totalorder %s1061_s30, %s1055_s9 }
  0x5c   : > { %466 = vmatpush1.bf16.msra.mxu0 %v956_v8  ;;  %853 = vmatpush1.bf16.msra.mxu1 %v956_v8 }
  0x5d   : > { %467 = vmatprep.subr.bf16.mxu0 %v957_v9  ;;  %846 = vmatprep.subr.bf16.mxu1 %v957_v9  ;;  %p1064_p4 = por %p1063_p3, %p1062_p0 }
  0x5f   : > { %p1065_p6 = pnand %p1064_p4, %p1058_p1 }
  0x60   : > { %468 = vmatpush1.bf16.msra.mxu0 %v959_v10  ;;  %854 = vmatpush1.bf16.msra.mxu1 %v959_v10 }
  0x61   : > { %469 = vmatprep.subr.bf16.mxu0 %v960_v11  ;;  %847 = vmatprep.subr.bf16.mxu1 %v960_v11 }
  0x64   : > { %470 = vmatpush1.bf16.msra.mxu0 %v962_v12  ;;  %855 = vmatpush1.bf16.msra.mxu1 %v962_v12 }
  0x65   : > { %471 = vmatprep.subr.bf16.mxu0 %v963_v13  ;;  %848 = vmatprep.subr.bf16.mxu1 %v963_v13 }
  0x68   : > { %472 = vmatpush1.bf16.msra.mxu0 %v965_v14  ;;  %856 = vmatpush1.bf16.msra.mxu1 %v965_v14 }
  0x69   : > { %473 = vmatprep.subr.bf16.mxu0 %v966_v15  ;;  %849 = vmatprep.subr.bf16.mxu1 %v966_v15 }
  0x6c   : > { %474 = vmatpush1.bf16.msra.mxu0 %v968_v16  ;;  %857 = vmatpush1.bf16.msra.mxu1 %v968_v16 }
  0x6f   : > { %492 = vmatmul.mubr.bf16.vlgmr.msra.gmra.mxu0 %v969_v17  ;;  %512 = vmatmul.mubr.bf16.vlgmr.msra.gmra.mxu1 %v970_v18 }
  0x70   : > { %501 = vmatprep.mubr.bf16.mxu0 %v1149_v0  ;;  %521 = vmatprep.mubr.bf16.mxu1 %v1149_v0 }
  0x77   : > { %502 = vmatmul.mubr.bf16.gmra.mxu0 %v971_v19  ;;  %522 = vmatmul.mubr.bf16.gmra.mxu1 %v972_v20 }
 0x12f   : > { %v493_v28 = vpop.f32.mrf.mxu0  ;;  %v513_v29 = vpop.f32.mrf.mxu1 }
 0x130   : > { %v532_v32 = vadd.f32 %v493_v28, %v292_v26  ;;  %v540_v33 = vadd.f32 %v513_v29, %v292_v26 }
 0x131   : > { %v495_v30 = vpop.f32.mrf.mxu0  ;;  %v515_v31 = vpop.f32.mrf.mxu1 }
 0x132   : > { %v533_v34 = vadd.f32 %v495_v30, %v296_v27  ;;  %v541_v35 = vadd.f32 %v515_v31, %v296_v27 }
 0x133   : > { %v497_v36 = vpop.f32.mrf.mxu0  ;;  %v517_v37 = vpop.f32.mrf.mxu1 }
 0x134   : > { %v833_v38 = vpack.c.bf16 %v533_v34, %v532_v32  ;;  %v837_v39 = vpack.c.bf16 %v541_v35, %v540_v33  ;;  %v534_v42 = vadd.f32 %v497_v36, %v292_v26  ;;  %v542_v43 = vadd.f32 %v517_v37, %v292_v26 }
 0x135   : > { %v499_v40 = vpop.f32.mrf.mxu0  ;;  %v519_v41 = vpop.f32.mrf.mxu1 }
 0x136   : > { %631 = vst [vmem:[%s1339_s27] sm:$0xff] %v833_v38  ;;  %635 = vst [vmem:[%s1339_s27 + $0x20] sm:$0xff] %v837_v39  ;;  %v535_v44 = vadd.f32 %v499_v40, %v296_v27  ;;  %v543_v45 = vadd.f32 %v519_v41, %v296_v27 }
 0x137   : > { %v503_v46 = vpop.f32.mrf.mxu0  ;;  %v523_v47 = vpop.f32.mrf.mxu1 }
 0x138   : > { %v834_v48 = vpack.c.bf16 %v535_v44, %v534_v42  ;;  %v838_v49 = vpack.c.bf16 %v543_v45, %v542_v43  ;;  %v536_v52 = vadd.f32 %v503_v46, %v292_v26  ;;  %v544_v53 = vadd.f32 %v523_v47, %v292_v26 }
 0x139   : > { %v505_v50 = vpop.f32.mrf.mxu0  ;;  %v525_v51 = vpop.f32.mrf.mxu1 }
 0x13a   : > { %632 = vst [vmem:[%s1339_s27 + $0x8] sm:$0xff] %v834_v48  ;;  %636 = vst [vmem:[%s1339_s27 + $0x28] sm:$0xff] %v838_v49  ;;  %v537_v54 = vadd.f32 %v505_v50, %v296_v27  ;;  %v545_v55 = vadd.f32 %v525_v51, %v296_v27 }
 0x13b   : > { %v507_v56 = vpop.f32.mrf.mxu0  ;;  %v527_v57 = vpop.f32.mrf.mxu1 }
 0x13c   : > { %v835_v58 = vpack.c.bf16 %v537_v54, %v536_v52  ;;  %v839_v59 = vpack.c.bf16 %v545_v55, %v544_v53  ;;  %v538_v62 = vadd.f32 %v507_v56, %v292_v26  ;;  %v546_v63 = vadd.f32 %v527_v57, %v292_v26 }
 0x13d   : > { %v509_v60 = vpop.f32.mrf.mxu0  ;;  %v529_v61 = vpop.f32.mrf.mxu1 }
 0x13e   : > { %633 = vst [vmem:[%s1339_s27 + $0x10] sm:$0xff] %v835_v58  ;;  %637 = vst [vmem:[%s1339_s27 + $0x30] sm:$0xff] %v839_v59  ;;  %v539_v0 = vadd.f32 %v509_v60, %v296_v27  ;;  %v547_v1 = vadd.f32 %v529_v61, %v296_v27 }
 0x140   : > { %v836_v2 = vpack.c.bf16 %v539_v0, %v538_v62  ;;  %v840_v3 = vpack.c.bf16 %v547_v1, %v546_v63 }
 0x142   : > { %634 = vst [vmem:[%s1339_s27 + $0x18] sm:$0xff] %v836_v2  ;;  %638 = vst [vmem:[%s1339_s27 + $0x38] sm:$0xff] %v840_v3 }
 0x143   : > { %1068 = shalt.err (!%p1065_p6)
}
 0x144   : > { %s1069_s29 = scalar_lea.hbm %s1354_s8, 1024  ;;  %s1073_s5 = scalar_lea.hbm %s1407_s3, 2048 }
 0x145   : > { %p1070_p8 = scmp.ne.s32.totalorder %s1354_s8, %s1069_s29  ;;  %p1074_p11 = scmp.lt.s32.totalorder %s1354_s8, %s1407_s3 }
 0x146   : > { %p1075_p12 = scmp.lt.s32.totalorder %s1073_s5, %s1069_s29 }
 0x147   : > { %p1071_p5 = pnand %p1070_p8, %p1420_p10 }
 0x148   : > { %p1076_p13 = por %p1075_p12, %p1074_p11 }
 0x149   : > { %p1072_p9 = pneg %p1071_p5 }
 0x14b   : > { %p1077_p7 = pnand %p1076_p13, %p1072_p9 }
 0x14d   : > { %1080 = shalt.err (!%p1077_p7)
}
 0x14e   : > { %s1151_s27 = smov 128   ;;  %s1152_s19 = smov 256  }
 0x14f   : > { %s1153_s6 = smov 8  }
 0x150   : > { %866 = dma.vmem_to_hbm [thread:$0]  (%p1420_p10), %s1347_s10, 1024, %s1354_s8, %s640_s15, %s1151_s27, %s1152_s19, %s1153_s6  }
 0x151 PF: > { %s671_s4 = sand.u32 1, %s1119_s12   ;;  %p1421_p2 = scmp.ne.s32.totalorder %s1414_s26, 0 }
 0x152   : > { %p1422_p1 = scmp.ge.s32.totalorder %s1139_s17, 2  ;;  %s672_s9 = scalar_lea.sflag [#allocation5], %s671_s4 }
 0x154   : > { %p880_p0 = pnand %p1422_p1, %p1421_p2 }
 0x156   : > { %p881_p3 = pneg %p880_p0 }
 0x158   : > { %1114 = dma.done.wait (%p881_p3), %s672_s9, 1024  }
 0x159   : > { %1116 = vsyncadd (%p881_p3), %s672_s9, 4294966272  ;;  %s20_s17 = sadd.s32 1, %s1139_s17   ;;  %s1423_s12 = smov %s1123_s13 }
 0x15a   : > { %p17_p4 = scmp.ge.s32.totalorder %s20_s17, 4   ;;  %s1424_s13 = smov %s1127_s14 }
 0x15b   : > { %s1425_s14 = smov %s1222_s24  ;;  %s1426_s15 = smov %s1135_s16 }
 0x15c   : > { %s1427_s16 = smov %s1429_s18  ;;  %19 = sbr.rel (!%p17_p4) target bundleno = 7 (0x7), region = 102 }
 0x161   :  { %677 = vsyncpa [#allocation4], 1 }
 0x162   :  { %679 = vsyncpa [#allocation4 + $0x1], 1 }
 0x163   :  { %680 = vsyncpa [#allocation7], 1 }
 0x164   :  { %682 = vsyncpa [#allocation7 + $0x1], 1 }
 0x165   :  { %683 = vsyncpa [#allocation5], 1 }
 0x166   :  { %685 = vsyncpa [#allocation5 + $0x1], 1 }

</bundles_post_ra>
